<compile_context>
chip_gen: v7x
topology: tpu7x:2x2x1
jax: 0.10.0
libtpu: 0.0.40
codegen_flags: <defaults>
</compile_context>

<pallas_src>
import functools

import jax
import jax.numpy as jnp
from jax.experimental import pallas as pl
from jax.experimental.pallas import tpu as pltpu


def _round_up(x, m):
    return ((x + m - 1) // m) * m


def _mlp_kernel(x_ref, w_gate_ref, w_up_ref, w_down_ref, o_ref, acc_ref):
    # x_ref:      (tm, H)   token tile, invariant over the j (I-tile) axis
    # w_gate_ref: (H, ti)   gate weight tile
    # w_up_ref:   (H, ti)   up weight tile
    # w_down_ref: (ti, H)   down weight tile
    # o_ref:      (tm, H)   output tile (resident across j)
    # acc_ref:    (tm, H)   f32 accumulator scratch
    j = pl.program_id(1)

    @pl.when(j == 0)
    def _():
        acc_ref[...] = jnp.zeros_like(acc_ref)

    x = x_ref[...]

    # First matmul pair on the MXU, f32 accumulate.
    gate = jnp.dot(x, w_gate_ref[...], preferred_element_type=jnp.float32)  # (tm, ti)
    up = jnp.dot(x, w_up_ref[...], preferred_element_type=jnp.float32)      # (tm, ti)

    # SiluAndMul in f32 (silu(g) = g * sigmoid(g)); sigmoid goes to the EUP.
    act = (gate * jax.nn.sigmoid(gate)) * up                                # (tm, ti)

    # Partial down projection for this I-tile, accumulated in f32.
    acc_ref[...] += jnp.dot(act.astype(w_down_ref.dtype), w_down_ref[...],
                            preferred_element_type=jnp.float32)             # (tm, H)

    @pl.when(j == pl.num_programs(1) - 1)
    def _():
        o_ref[...] = acc_ref[...].astype(o_ref.dtype)


def deepseek_v3_mlp(x, w_gate_up, w_down, *, tm=128, ti=512):
    """DeepseekV3 MLP forward.

    x:         [T, H]
    w_gate_up: [H, 2*I]   (gate columns first, then up columns)
    w_down:    [I, H]
    returns    [T, H]
    """
    T, H = x.shape
    H2, two_I = w_gate_up.shape
    I, H3 = w_down.shape
    assert H == H2 == H3 and two_I == 2 * I

    # --- token tile: clamp to (padded) T, keep it a multiple of 8 sublanes ---
    tm = max(8, min(tm, _round_up(T, 8)))
    T_pad = _round_up(T, tm)
    if T_pad != T:
        x = jnp.pad(x, ((0, T_pad - T), (0, 0)))

    # --- intermediate tile: multiple of 128 lanes that divides I ------------
    ti = min(ti, I)
    if I % ti != 0 or ti % 128 != 0:
        ti = I
        for cand in (512, 384, 256, 128):
            if cand <= I and I % cand == 0:
                ti = cand
                break

    # Split the merged gate_up weight once on the host side so each tile is a
    # simple rectangular BlockSpec window (in production these would be stored
    # as two separate [H, I] arrays).
    w_gate = w_gate_up[:, :I]
    w_up = w_gate_up[:, I:]

    grid = (T_pad // tm, I // ti)

    out = pl.pallas_call(
        _mlp_kernel,
        out_shape=jax.ShapeDtypeStruct((T_pad, H), x.dtype),
        grid_spec=pltpu.PrefetchScalarGridSpec(
            num_scalar_prefetch=0,
            grid=grid,
            in_specs=[
                pl.BlockSpec((tm, H), lambda i, j: (i, 0)),   # x (invariant over j)
                pl.BlockSpec((H, ti), lambda i, j: (0, j)),   # gate weight tile
                pl.BlockSpec((H, ti), lambda i, j: (0, j)),   # up weight tile
                pl.BlockSpec((ti, H), lambda i, j: (j, 0)),   # down weight tile
            ],
            out_specs=pl.BlockSpec((tm, H), lambda i, j: (i, 0)),
            scratch_shapes=[pltpu.VMEM((tm, H), jnp.float32)],
        ),
        compiler_params=pltpu.CompilerParams(
            dimension_semantics=("parallel", "arbitrary"),
            vmem_limit_bytes=64 * 1024 * 1024,
        ),
    )(x, w_gate, w_up, w_down)

    return out[:T]


def _reference(x, w_gate_up, w_down):
    x = x.astype(jnp.float32)
    gate_up = x @ w_gate_up.astype(jnp.float32)
    I = w_down.shape[0]
    gate, up = gate_up[:, :I], gate_up[:, I:]
    act = jax.nn.silu(gate) * up
    return act @ w_down.astype(jnp.float32)


if __name__ == "__main__":
    # Small shapes consistent with the module's forward:
    # num_tokens=16, hidden_size=128, intermediate_size=256.
    num_tokens = 16
    hidden_size = 128
    intermediate_size = 256

    key = jax.random.PRNGKey(0)
    kx, kgu, kdn = jax.random.split(key, 3)

    x = jax.random.normal(kx, (num_tokens, hidden_size), dtype=jnp.float32)
    w_gate_up = jax.random.normal(
        kgu, (hidden_size, 2 * intermediate_size), dtype=jnp.float32) * 0.02
    w_down = jax.random.normal(
        kdn, (intermediate_size, hidden_size), dtype=jnp.float32) * 0.02

    # f32 path: ti=128 so the I-reduction axis has 2 steps (exercises the
    # pl.when init / accumulate / finalize path).
    out = deepseek_v3_mlp(x, w_gate_up, w_down, tm=128, ti=128)
    out = jax.block_until_ready(out)
    ref = _reference(x, w_gate_up, w_down)
    assert out.shape == (num_tokens, hidden_size)
    assert jnp.allclose(out, ref, atol=1e-4, rtol=1e-4), "f32 mismatch vs reference"

    # bf16 path (production dtype: weights/activations bf16, f32 accumulate).
    x_bf = x.astype(jnp.bfloat16)
    wgu_bf = w_gate_up.astype(jnp.bfloat16)
    wdn_bf = w_down.astype(jnp.bfloat16)
    out_bf = deepseek_v3_mlp(x_bf, wgu_bf, wdn_bf, tm=128, ti=128)
    out_bf = jax.block_until_ready(out_bf)
    ref_bf = _reference(x_bf, wgu_bf, wdn_bf)
    assert out_bf.shape == (num_tokens, hidden_size)
    assert jnp.allclose(out_bf.astype(jnp.float32), ref_bf, atol=2e-2, rtol=2e-2), \
        "bf16 mismatch vs reference"

    print("KERNEL_OK")
</pallas_src>

<mosaic_0001>
module attributes {stable_mosaic.version = 11 : i64} {
  func.func @_mlp_kernel(%arg0: i32, %arg1: i32, %arg2: memref<16x128xf32, #tpu.memory_space<vmem>>, %arg3: memref<128x128xf32, #tpu.memory_space<vmem>>, %arg4: memref<128x128xf32, #tpu.memory_space<vmem>>, %arg5: memref<128x128xf32, #tpu.memory_space<vmem>>, %arg6: memref<16x128xf32, #tpu.memory_space<vmem>>, %arg7: memref<16x128xf32, #tpu.memory_space<vmem>>) attributes {dimension_semantics = [#tpu.dimension_semantics<parallel>, #tpu.dimension_semantics<arbitrary>], iteration_bounds = array<i64: 1, 2>, scalar_prefetch = 0 : i64, scratch_operands = 1 : i64, tpu.core_type = #tpu.core_type<tc>, window_params = [{transform_indices = @transform_0, window_bounds = array<i64: 16, 128>}, {transform_indices = @transform_1, window_bounds = array<i64: 128, 128>}, {transform_indices = @transform_2, window_bounds = array<i64: 128, 128>}, {transform_indices = @transform_3, window_bounds = array<i64: 128, 128>}, {transform_indices = @transform_4, window_bounds = array<i64: 16, 128>}]} {
    %c0_i32 = arith.constant 0 : i32
    %0 = arith.cmpi eq, %arg1, %c0_i32 : i32
    %1 = arith.extui %0 : i1 to i32
    %c0_i32_0 = arith.constant 0 : i32
    %2 = arith.cmpi ne, %1, %c0_i32_0 : i32
    scf.if %2 {
      %cst_16 = arith.constant 0.000000e+00 : f32
      %23 = vector.broadcast %cst_16 : f32 to vector<16x128xf32>
      %c0_17 = arith.constant 0 : index
      %c0_18 = arith.constant 0 : index
      %24 = vector.load %arg7[%c0_17, %c0_18] : memref<16x128xf32, #tpu.memory_space<vmem>>, vector<16x128xf32>
      tpu.vector_store %arg7[%c0_17, %c0_18], %23 {strides = array<i32>} : memref<16x128xf32, #tpu.memory_space<vmem>>, vector<16x128xf32>,
    } else {
    }
    %c0 = arith.constant 0 : index
    %c0_1 = arith.constant 0 : index
    %3 = vector.load %arg2[%c0, %c0_1] : memref<16x128xf32, #tpu.memory_space<vmem>>, vector<16x128xf32>
    %c0_2 = arith.constant 0 : index
    %c0_3 = arith.constant 0 : index
    %4 = vector.load %arg3[%c0_2, %c0_3] : memref<128x128xf32, #tpu.memory_space<vmem>>, vector<128x128xf32>
    %cst = arith.constant dense<0.000000e+00> : vector<16x128xf32>
    %5 = tpu.matmul %3, %4, %cst {dimension_numbers = #tpu.dot_dimension_numbers<[1], [0], [0], [1], [0, 0, 1, 1], [], []>} : vector<16x128xf32>, vector<128x128xf32>, vector<16x128xf32> -> vector<16x128xf32>
    %c0_4 = arith.constant 0 : index
    %c0_5 = arith.constant 0 : index
    %6 = vector.load %arg4[%c0_4, %c0_5] : memref<128x128xf32, #tpu.memory_space<vmem>>, vector<128x128xf32>
    %cst_6 = arith.constant dense<0.000000e+00> : vector<16x128xf32>
    %7 = tpu.matmul %3, %6, %cst_6 {dimension_numbers = #tpu.dot_dimension_numbers<[1], [0], [0], [1], [0, 0, 1, 1], [], []>} : vector<16x128xf32>, vector<128x128xf32>, vector<16x128xf32> -> vector<16x128xf32>
    %8 = arith.negf %5 : vector<16x128xf32>
    %9 = math.exp %8 : vector<16x128xf32>
    %cst_7 = arith.constant 1.000000e+00 : f32
    %10 = vector.broadcast %cst_7 : f32 to vector<16x128xf32>
    %11 = arith.addf %10, %9 : vector<16x128xf32>
    %12 = arith.divf %10, %11 : vector<16x128xf32>
    %13 = arith.mulf %5, %12 : vector<16x128xf32>
    %14 = arith.mulf %13, %7 : vector<16x128xf32>
    %c0_8 = arith.constant 0 : index
    %c0_9 = arith.constant 0 : index
    %15 = vector.load %arg7[%c0_8, %c0_9] : memref<16x128xf32, #tpu.memory_space<vmem>>, vector<16x128xf32>
    %c0_10 = arith.constant 0 : index
    %c0_11 = arith.constant 0 : index
    %16 = vector.load %arg5[%c0_10, %c0_11] : memref<128x128xf32, #tpu.memory_space<vmem>>, vector<128x128xf32>
    %cst_12 = arith.constant dense<0.000000e+00> : vector<16x128xf32>
    %17 = tpu.matmul %14, %16, %cst_12 {dimension_numbers = #tpu.dot_dimension_numbers<[1], [0], [0], [1], [0, 0, 1, 1], [], []>} : vector<16x128xf32>, vector<128x128xf32>, vector<16x128xf32> -> vector<16x128xf32>
    %18 = arith.addf %15, %17 : vector<16x128xf32>
    %c0_13 = arith.constant 0 : index
    %c0_14 = arith.constant 0 : index
    %19 = vector.load %arg7[%c0_13, %c0_14] : memref<16x128xf32, #tpu.memory_space<vmem>>, vector<16x128xf32>
    tpu.vector_store %arg7[%c0_13, %c0_14], %18 {strides = array<i32>} : memref<16x128xf32, #tpu.memory_space<vmem>>, vector<16x128xf32>,
    %c1_i32 = arith.constant 1 : i32
    %20 = arith.cmpi eq, %arg1, %c1_i32 : i32
    %21 = arith.extui %20 : i1 to i32
    %c0_i32_15 = arith.constant 0 : i32
    %22 = arith.cmpi ne, %21, %c0_i32_15 : i32
    scf.if %22 {
      %c0_16 = arith.constant 0 : index
      %c0_17 = arith.constant 0 : index
      %23 = vector.load %arg7[%c0_16, %c0_17] : memref<16x128xf32, #tpu.memory_space<vmem>>, vector<16x128xf32>
      %c0_18 = arith.constant 0 : index
      %c0_19 = arith.constant 0 : index
      %24 = vector.load %arg6[%c0_18, %c0_19] : memref<16x128xf32, #tpu.memory_space<vmem>>, vector<16x128xf32>
      tpu.vector_store %arg6[%c0_18, %c0_19], %23 {strides = array<i32>} : memref<16x128xf32, #tpu.memory_space<vmem>>, vector<16x128xf32>,
    } else {
    }
    return
  }
  func.func @transform_0(%arg0: i32, %arg1: i32) -> (i32, i32) {
    %c0_i32 = arith.constant 0 : i32
    %c0_i32_0 = arith.constant 0 : i32
    return %arg0, %c0_i32 : i32, i32
  }
  func.func @transform_1(%arg0: i32, %arg1: i32) -> (i32, i32) {
    %c0_i32 = arith.constant 0 : i32
    %c0_i32_0 = arith.constant 0 : i32
    return %c0_i32, %arg1 : i32, i32
  }
  func.func @transform_2(%arg0: i32, %arg1: i32) -> (i32, i32) {
    %c0_i32 = arith.constant 0 : i32
    %c0_i32_0 = arith.constant 0 : i32
    return %c0_i32, %arg1 : i32, i32
  }
  func.func @transform_3(%arg0: i32, %arg1: i32) -> (i32, i32) {
    %c0_i32 = arith.constant 0 : i32
    %c0_i32_0 = arith.constant 0 : i32
    return %arg1, %c0_i32 : i32, i32
  }
  func.func @transform_4(%arg0: i32, %arg1: i32) -> (i32, i32) {
    %c0_i32 = arith.constant 0 : i32
    %c0_i32_0 = arith.constant 0 : i32
    return %arg0, %c0_i32 : i32, i32
  }
}

</mosaic_0001>

<bundles_post_ra>
// kernel: tpu_custom_call.1
= control target key start
LH: loop header
LB: loop body
LE: loop exit
PB: predicated region body
PF: predicated region fallthrough
CT: control target
= control target key end

     0   :  { %s1721_s0 = inlined_call_operand.hbm [shape: f32[16,128], index: 0, kind: input, shape index: {}]   ;;  %s1722_s1 = inlined_call_operand.hbm [shape: f32[128,256], index: 1, kind: input, shape index: {}]   ;;  %s1723_s2 = inlined_call_operand.hbm [shape: f32[128,256], index: 2, kind: input, shape index: {}]   ;;  %s1724_s3 = inlined_call_operand.hbm [shape: f32[256,128], index: 3, kind: input, shape index: {}]   ;;  %s1725_s4 = inlined_call_operand.hbm [shape: f32[16,128], index: 4, kind: output, shape index: {}]  }
   0x1   :  { %1737 = sst [smem:[#allocation16_spill]] %s1722_s1 }
   0x2   :  { %1738 = sst [smem:[#allocation17_spill]] %s1723_s2 }
   0x3   :  { %9 = vsyncpa [#allocation4], 0 }
   0x4   :  { %10 = vsyncpa [#allocation7], 0 }
   0x5   :  { %12 = vsyncpa [#allocation7 + $0x1], 0 }
   0x6   :  { %13 = vsyncpa [#allocation10], 0 }
   0x7   :  { %15 = vsyncpa [#allocation10 + $0x1], 0 }
   0x8   :  { %16 = vsyncpa [#allocation5], 0  ;;  %s1384_s15 = smov 0   ;;  %s1386_s16 = smov 0  }
   0x9   :  { %s1388_s17 = smov 0   ;;  %s1390_s18 = smov 0  }
   0xa   :  { %s1392_s19 = smov 0   ;;  %s1394_s20 = smov 0  }
   0xb LB: > { %s31_s21 = sadd.s32 1, %s1342_s19  ;;  %s67_s22 = sadd.s32 1, %s1334_s17  ;;  %s1346_s20 = sphi %s1394_s20, %s22_s20   ;;  %s1342_s19 = sphi %s1392_s19, %s1761_s19   ;;  %s1338_s18 = sphi %s1390_s18, %s1760_s18   ;;  %s1334_s17 = sphi %s1388_s17, %s1759_s17   ;;  %s1330_s16 = sphi %s1386_s16, %s1758_s16   ;;  %s1326_s15 = sphi %s1384_s15, %s1757_s15  }
   0xc   : > { %p32_p0 = scmp.ge.s32.totalorder %s31_s21, 2  ;;  %p74_p1 = scmp.ne.s32.totalorder %s1334_s17, %s1330_s16 }
   0xd   : > { %p75_p2 = scmp.eq.s32.totalorder %s1346_s20, 0  ;;  %p1072_p5 = scmp.lt.s32.totalorder %s1346_s20, 2 }
   0xe   : > { %s1763_s21 = smov (%p32_p0, %s31_s21), 0  ;;  %s198_s25 = sand.u32 1, %s1346_s20  }
   0xf   : > { %p1421_p3 = por %p75_p2, %p74_p1  ;;  %s64_s24 = ssub.s32 %s1342_s19, %s1763_s21 }
  0x10   : > { %p65_p4 = scmp.eq.s32.totalorder %s64_s24, 0  ;;  %s1726_s26 = sand.u32 1, %s1334_s17  }
  0x11   : > { %s1435_s28 = sshll.u32 %s1726_s26, 7  ;;  %s768_s29 = sshll.u32 %s1342_s19, 7 }
  0x12   : > { %s1431_s27 = scalar_select %p65_p4, %s1334_s17, %s67_s22  }
  0x13   : > { %s1740_s1 = sld [smem:[#allocation16_spill]]  ;;  %s202_s7 = scalar_lea.vmem [#allocation6], %s1435_s28 }
  0x14   : > { %s208_s8 = sshll.u32 %s202_s7, 4  ;;  %p1448_p6 = pnand %p1072_p5, %p1421_p3  ;;  %s1444_s8 = int_to_ptr.vmem [resolvable:$true] %s208_s8 }
  0x15   : > { %s1742_s2 = sld [smem:[#allocation17_spill]]  ;;  %s1457_s13 = scalar_lea.sflag [#allocation7], %s198_s25 }
  0x16   : > { %s1741_s9 = scalar_select %p1448_p6, 1, 0 }
  0x17   : > { %p1463_p8 = pneg %p1448_p6 }
  0x19   : > { %s1441_s6 = scalar_lea.hbm %s1740_s1, %s768_s29  ;;  %s1145_s30 = scalar_lea.hbm %s1740_s1, 4096 }
  0x1a   : > { %s1140_s14 = scalar_lea.hbm %s1441_s6, 2048  ;;  %p1146_p11 = scmp.lt.u32.totalorder %s1441_s6, %s1740_s1 }
  0x1b   : > { %s1455_s12 = scalar_lea.hbm %s1742_s2, %s768_s29  ;;  %p1141_p7 = scmp.ne.s32.totalorder %s1441_s6, %s1140_s14 }
  0x1c   : > { %s1743_s22 = scalar_select %p1463_p8, 1, 0 }
  0x1d   : > { %p1143_p9 = pnand %p1463_p8, %p1141_p7  ;;  %p1147_p12 = scmp.lt.u32.totalorder %s1145_s30, %s1140_s14 }
  0x1e   : > { %p1149_p0 = scmp.lt.u32.totalorder %s1140_s14, %s1441_s6 }
  0x1f   : > { %p1144_p10 = pneg %p1143_p9  ;;  %p1148_p13 = por %p1147_p12, %p1146_p11 }
  0x21   : > { %p1150_p1 = por %p1149_p0, %p1148_p13 }
  0x23   : > { %p1151_p2 = pnand %p1150_p1, %p1144_p10 }
  0x25   : > { %1154 = shalt.err (!%p1151_p2)
}
  0x26   : > { %s1155_s25 = scalar_lea.vmem %s1444_s8, 2048  ;;  %s1348_s7 = smov [#allocation6]  }
  0x27   : > { %p1156_p3 = scmp.ne.s32.totalorder %s1444_s8, %s1155_s25  ;;  %s1160_s10 = sshll.u32 %s1348_s7, 4  ;;  %s1161_s10 = int_to_ptr.vmem [resolvable:$false] %s1160_s10 }
  0x28   : > { %s1162_s11 = scalar_lea.vmem %s1161_s10, 4096  ;;  %p1163_p7 = scmp.lt.s32.totalorder %s1444_s8, %s1161_s10 }
  0x29   : > { %p1158_p4 = pnand %p1156_p3, %p1463_p8  ;;  %p1164_p9 = scmp.lt.s32.totalorder %s1162_s11, %s1155_s25 }
  0x2b   : > { %p1159_p5 = pneg %p1158_p4  ;;  %p1165_p11 = por %p1164_p9, %p1163_p7 }
  0x2d   : > { %p1166_p12 = pnand %p1165_p11, %p1159_p5 }
  0x2f   : > { %1169 = shalt.err (!%p1166_p12)
}
  0x30   : > { %s1727_s14 = smov 256   ;;  %s1728_s23 = smov 128  }
  0x31   : > { %s1351_s24 = smov 8   ;;  %s1491_s30 = sadd.s32 4294967295, %s1346_s20  }
  0x32   : > { %1064 = dma.hbm_to_vmem [thread:$0]  (!%p1448_p6), %s1441_s6, 2048, %s1444_s8, %s1457_s13, %s1727_s14, %s1728_s23, %s1351_s24  }
  0x33   : > { %p80_p10 = scmp.ne.s32.totalorder %s1330_s16, %s1326_s15  ;;  %p1730_p13 = scmp.eq.s32.totalorder %s1491_s30, 0 }
  0x34   : > { %p764_p0 = scmp.ge.s32.totalorder %s1346_s20, 1  ;;  %p169_p1 = scmp.lt.s32.totalorder %s1346_s20, 3 }
  0x35   : > { %p1500_p2 = por %p1730_p13, %p80_p10  ;;  %s1352_s8 = smov [#allocation3]  }
  0x36   : > { %p1504_p3 = pnand %p764_p0, %p169_p1  ;;  %s184_s29 = sshll.u32 %s1352_s8, 4  ;;  %s1510_s29 = int_to_ptr.vmem [resolvable:$true] %s184_s29 }
  0x37   : > { %s1744_s5 = scalar_select %p1500_p2, 1, 0 }
  0x38   : > { %s1745_s6 = scalar_select %p1504_p3, 1, 0 }
  0x39   : > { %p1057_p4 = pneg %p1504_p3  ;;  %s222_s15 = scalar_lea.vmem [#allocation8], %s1435_s28 }
  0x3a   : > { %s228_s25 = sshll.u32 %s222_s15, 4  ;;  %s1170_s10 = scalar_lea.hbm %s1455_s12, 2048  ;;  %s1519_s25 = int_to_ptr.vmem [resolvable:$true] %s228_s25 }
  0x3b   : > { %p1515_p5 = pnand %p1057_p4, %p1730_p13  ;;  %p1171_p7 = scmp.ne.s32.totalorder %s1455_s12, %s1170_s10 }
  0x3c   : > { %s1175_s26 = scalar_lea.hbm %s1742_s2, 4096  ;;  %p1176_p12 = scmp.lt.u32.totalorder %s1455_s12, %s1742_s2 }
  0x3d   : > { %s1746_s7 = scalar_select %p1515_p5, 1, 0 }
  0x3e   : > { %p1173_p9 = pnand %p1171_p7, %p1463_p8  ;;  %p1177_p10 = scmp.lt.u32.totalorder %s1175_s26, %s1170_s10 }
  0x3f   : > { %p1179_p1 = scmp.lt.u32.totalorder %s1170_s10, %s1455_s12 }
  0x40   : > { %p1174_p11 = pneg %p1173_p9  ;;  %p1178_p0 = por %p1177_p10, %p1176_p12 }
  0x42   : > { %p1180_p4 = por %p1179_p1, %p1178_p0 }
  0x44   : > { %p1181_p13 = pnand %p1180_p4, %p1174_p11 }
  0x46   : > { %1184 = shalt.err (!%p1181_p13)
}
  0x47   : > { %s1185_s15 = scalar_lea.vmem %s1519_s25, 2048  ;;  %s1353_s11 = smov [#allocation8]  }
  0x48   : > { %p1186_p7 = scmp.ne.s32.totalorder %s1519_s25, %s1185_s15  ;;  %s1190_s8 = sshll.u32 %s1353_s11, 4  ;;  %s1191_s8 = int_to_ptr.vmem [resolvable:$false] %s1190_s8 }
  0x49   : > { %s1192_s14 = scalar_lea.vmem %s1191_s8, 4096  ;;  %p1193_p3 = scmp.lt.s32.totalorder %s1519_s25, %s1191_s8 }
  0x4a   : > { %p1188_p9 = pnand %p1186_p7, %p1463_p8  ;;  %p1194_p5 = scmp.lt.s32.totalorder %s1192_s14, %s1185_s15 }
  0x4c   : > { %p1189_p2 = pneg %p1188_p9  ;;  %p1195_p12 = por %p1194_p5, %p1193_p3 }
  0x4e   : > { %p1196_p10 = pnand %p1195_p12, %p1189_p2 }
  0x50   : > { %1199 = shalt.err (!%p1196_p10)
}
  0x51   : > { %s1747_s26 = smov 128   ;;  %s1748_s23 = smov 256  }
  0x52   : > { %1067 = dma.hbm_to_vmem [thread:$0]  (!%p1448_p6), %s1455_s12, 2048, %s1519_s25, %s1457_s13, %s1748_s23, %s1747_s26, %s1351_s24  }
  0x53   : > { %s1200_s11 = scalar_lea.hbm %s1721_s0, 256  ;;  %p1749_p2 = scmp.ne.s32.totalorder %s1746_s7, 0 }
  0x54   : > { %p1201_p13 = scmp.ne.s32.totalorder %s1721_s0, %s1200_s11  ;;  %p1207_p0 = scmp.lt.u32.totalorder %s1200_s11, %s1721_s0 }
  0x55   : > { %p1202_p3 = pneg %p1749_p2 }
  0x57   : > { %p1203_p5 = pnand %p1202_p3, %p1201_p13 }
  0x59   : > { %p1204_p11 = pneg %p1203_p5 }
  0x5b   : > { %p1209_p1 = pnand %p1207_p0, %p1204_p11 }
  0x5d   : > { %1212 = shalt.err (!%p1209_p1)
}
  0x5e   : > { %s1213_s12 = scalar_lea.vmem %s1510_s29, 256  ;;  %p1221_p12 = scmp.lt.s32.totalorder %s1510_s29, %s1510_s29 }
  0x5f   : > { %p1214_p4 = scmp.ne.s32.totalorder %s1510_s29, %s1213_s12  ;;  %p1222_p10 = scmp.lt.s32.totalorder %s1213_s12, %s1213_s12 }
  0x61   : > { %p1216_p7 = pnand %p1214_p4, %p1202_p3  ;;  %p1223_p6 = por %p1222_p10, %p1221_p12 }
  0x63   : > { %p1217_p9 = pneg %p1216_p7 }
  0x65   : > { %p1224_p8 = pnand %p1223_p6, %p1217_p9 }
  0x67   : > { %1227 = shalt.err (!%p1224_p8)
}
  0x68   : > { %1060 = dma.hbm_to_vmem [thread:$0]  (!%p1749_p2), %s1721_s0, 256, %s1510_s29, [#allocation4], %s1747_s26, %s1747_s26, %s1351_s24  }
  0x69   : > { %s787_s13 = sshll.u32 %s1342_s19, 11  ;;  %s242_s25 = scalar_lea.vmem [#allocation9], %s1435_s28 }
  0x6a   : > { %s249_s23 = sshll.u32 %s242_s25, 4  ;;  %s1575_s8 = scalar_lea.hbm %s1724_s3, %s787_s13  ;;  %s1577_s23 = int_to_ptr.vmem [resolvable:$true] %s249_s23 }
  0x6b   : > { %s1750_s7 = sand.u32 1, %s1334_s17   ;;  %s1228_s14 = scalar_lea.hbm %s1575_s8, 2048 }
  0x6c   : > { %s1581_s15 = scalar_lea.sflag [#allocation10], %s1750_s7  ;;  %p1229_p6 = scmp.ne.s32.totalorder %s1575_s8, %s1228_s14 }
  0x6d   : > { %p1751_p8 = scmp.ne.s32.totalorder %s1743_s22, 0  ;;  %s1233_s12 = scalar_lea.hbm %s1724_s3, 4096 }
  0x6e   : > { %p1234_p3 = scmp.lt.u32.totalorder %s1575_s8, %s1724_s3  ;;  %p1235_p5 = scmp.lt.u32.totalorder %s1233_s12, %s1228_s14 }
  0x6f   : > { %p1231_p13 = pnand %p1229_p6, %p1751_p8  ;;  %p1237_p0 = scmp.lt.u32.totalorder %s1228_s14, %s1575_s8 }
  0x70   : > { %p1236_p11 = por %p1235_p5, %p1234_p3 }
  0x71   : > { %p1232_p2 = pneg %p1231_p13 }
  0x72   : > { %p1238_p1 = por %p1237_p0, %p1236_p11 }
  0x74   : > { %p1239_p4 = pnand %p1238_p1, %p1232_p2 }
  0x76   : > { %1242 = shalt.err (!%p1239_p4)
}
  0x77   : > { %s1243_s13 = scalar_lea.vmem %s1577_s23, 2048  ;;  %s1354_s25 = smov [#allocation9]  }
  0x78   : > { %p1244_p7 = scmp.ne.s32.totalorder %s1577_s23, %s1243_s13  ;;  %s1248_s10 = sshll.u32 %s1354_s25, 4  ;;  %s1249_s10 = int_to_ptr.vmem [resolvable:$false] %s1248_s10 }
  0x79   : > { %s1250_s11 = scalar_lea.vmem %s1249_s10, 4096  ;;  %p1251_p10 = scmp.lt.s32.totalorder %s1577_s23, %s1249_s10 }
  0x7a   : > { %p1246_p9 = pnand %p1244_p7, %p1751_p8  ;;  %p1252_p6 = scmp.lt.s32.totalorder %s1250_s11, %s1243_s13 }
  0x7c   : > { %p1247_p12 = pneg %p1246_p9  ;;  %p1253_p13 = por %p1252_p6, %p1251_p10 }
  0x7e   : > { %p1254_p3 = pnand %p1253_p13, %p1247_p12 }
  0x80   : > { %1257 = shalt.err (!%p1254_p3)
}
  0x81   : > { %p1752_p2 = scmp.ne.s32.totalorder %s1741_s9, 0  ;;  %p1753_p8 = scmp.ne.s32.totalorder %s1745_s6, 0 }
  0x82   : > { %p1754_p5 = scmp.eq.s32.totalorder (!%p1753_p8), %s1491_s30, 0 }
  0x83   : > { %1070 = dma.hbm_to_vmem [thread:$0]  (!%p1752_p2), %s1575_s8, 2048, %s1577_s23, %s1581_s15, %s1747_s26, %s1747_s26, %s1351_s24  }
  0x84   : > { %261 = sbr.rel (%p1753_p8) target bundleno = 686 (0x2ae), region = 36 }
  0x8b   : > { %1309 = dma.done.wait (%p1754_p5), [#allocation4], 256   ;;  %p1755_p11 = pmov %p1754_p5 }
  0x8c   : > { %s267_s9 = sand.u32 1, %s1491_s30   ;;  %s269_s22 = sand.u32 1, %s1330_s16  }
  0x8d   : > { %1311 = vsyncadd (%p1755_p11), [#allocation4], 4294967040  ;;  %s776_s7 = sshll.u32 %s269_s22, 7  ;;  %s268_s14 = scalar_lea.sflag [#allocation7], %s267_s9 }
  0x8e   : > { %s1616_s28 = scalar_lea.vmem [#allocation6], %s776_s7  ;;  %p1756_p0 = scmp.ne.s32.totalorder %s1744_s5, 0 }
  0x90   : > { %1313 = dma.done.wait (%p1756_p0), %s268_s14, 4096  }
  0x91   : > { %1315 = vsyncadd (%p1756_p0), %s268_s14, 4294963200  ;;  %s1622_s24 = scalar_lea.vmem [#allocation8], %s776_s7  ;;  %s286_s6 = scalar_lea.sflag [#allocation10], %s269_s22 }
  0x92   : > { %s1624_s26 = scalar_lea.vmem [#allocation9], %s776_s7 }
  0x93   : > { %1317 = dma.done.wait (%p1756_p0), %s286_s6, 2048  }
  0x94   : > { %1319 = vsyncadd (%p1756_p0), %s286_s6, 4294965248  ;;  %p779_p1 = scmp.ne.s32.totalorder %s1338_s18, 0 }
  0x95   : > { %v1355_v0 = vmov (!%p779_p1), 0.0  }
  0x96   : > { %325 = sbr.rel (%p779_p1) target bundleno = 157 (0x9d), region = 56  ;;  %326 = vst [vmem:[#allocation2] sm:$0xff] (!%p779_p1), %v1355_v0  ;;  %327 = vst [vmem:[#allocation2 + $0x8] sm:$0xff] (!%p779_p1), %v1355_v0 }
  0x9d PF: > { %v330_v1 = vld [vmem:[%s1616_s28] sm:$0xff]  ;;  %v331_v2 = vld [vmem:[%s1616_s28 + $0x8] sm:$0xff]  ;;  %v332_v3 = vld [vmem:[%s1616_s28 + $0x10] sm:$0xff]  ;;  %p782_p4 = scmp.ne.s32.totalorder %s1338_s18, 1 }
  0x9e   : > { %v947_v4 = vpack.c.bf16 %v331_v2, %v330_v1  ;;  %v333_v5 = vld [vmem:[%s1616_s28 + $0x18] sm:$0xff]  ;;  %v334_v7 = vld [vmem:[%s1616_s28 + $0x20] sm:$0xff]  ;;  %v335_v8 = vld [vmem:[%s1616_s28 + $0x28] sm:$0xff] }
  0x9f   : > { %v951_v6 = vpack.c.bf16 %v333_v5, %v332_v3  ;;  %v421_v9 = vld [vmem:[%s1622_s24] sm:$0xff]  ;;  %v955_v10 = vpack.c.bf16 %v335_v8, %v334_v7  ;;  %v336_v11 = vld [vmem:[%s1616_s28 + $0x30] sm:$0xff]  ;;  %v337_v12 = vld [vmem:[%s1616_s28 + $0x38] sm:$0xff] }
  0xa0   : > { %948 = vmatprep.subr.bf16.mxu0 %v947_v4  ;;  %v422_v13 = vld [vmem:[%s1622_s24 + $0x8] sm:$0xff]  ;;  %v328_v15 = vld [vmem:[#allocation3] sm:$0xff]  ;;  %v424_v17 = vld [vmem:[%s1622_s24 + $0x18] sm:$0xff]  ;;  %v959_v21 = vpack.c.bf16 %v337_v12, %v336_v11 }
  0xa1   : > { %950 = vmatpush3.bf16.msra.mxu0 %v947_v4  ;;  %v979_v14 = vpack.c.bf16 %v422_v13, %v421_v9  ;;  %v423_v16 = vld [vmem:[%s1622_s24 + $0x10] sm:$0xff]  ;;  %874 = vmatprep.mubr.f32.mxu0 %v328_v15  ;;  %v425_v19 = vld [vmem:[%s1622_s24 + $0x20] sm:$0xff]  ;;  %v426_v20 = vld [vmem:[%s1622_s24 + $0x28] sm:$0xff] }
  0xa2   : > { %952 = vmatprep.subr.bf16.mxu0 %v951_v6  ;;  %v983_v18 = vpack.c.bf16 %v424_v17, %v423_v16  ;;  %909 = vmatprep.mubr.f32.mxu1 %v328_v15  ;;  %v338_v22 = vld [vmem:[%s1616_s28 + $0x40] sm:$0xff]  ;;  %v339_v23 = vld [vmem:[%s1616_s28 + $0x48] sm:$0xff]  ;;  %v987_v24 = vpack.c.bf16 %v426_v20, %v425_v19  ;;  %v427_v25 = vld [vmem:[%s1622_s24 + $0x30] sm:$0xff] }
  0xa3   : > { %980 = vmatprep.subr.bf16.mxu1 %v979_v14  ;;  %v428_v26 = vld [vmem:[%s1622_s24 + $0x38] sm:$0xff]  ;;  %v963_v27 = vpack.c.bf16 %v339_v23, %v338_v22  ;;  %v340_v28 = vld [vmem:[%s1616_s28 + $0x50] sm:$0xff]  ;;  %v429_v31 = vld [vmem:[%s1622_s24 + $0x40] sm:$0xff] }
  0xa4   : > { %982 = vmatpush3.bf16.msra.mxu1 %v979_v14  ;;  %v341_v29 = vld [vmem:[%s1616_s28 + $0x58] sm:$0xff]  ;;  %v991_v30 = vpack.c.bf16 %v428_v26, %v427_v25  ;;  %v430_v32 = vld [vmem:[%s1622_s24 + $0x48] sm:$0xff]  ;;  %v342_v34 = vld [vmem:[%s1616_s28 + $0x60] sm:$0xff] }
  0xa5   : > { %954 = vmatpush3.bf16.msra.mxu0 %v951_v6  ;;  %984 = vmatprep.subr.bf16.mxu1 %v983_v18  ;;  %v967_v33 = vpack.c.bf16 %v341_v29, %v340_v28  ;;  %v343_v35 = vld [vmem:[%s1616_s28 + $0x68] sm:$0xff]  ;;  %v995_v36 = vpack.c.bf16 %v430_v32, %v429_v31  ;;  %v431_v37 = vld [vmem:[%s1622_s24 + $0x50] sm:$0xff]  ;;  %v432_v38 = vld [vmem:[%s1622_s24 + $0x58] sm:$0xff] }
  0xa6   : > { %956 = vmatprep.subr.bf16.mxu0 %v955_v10  ;;  %v971_v39 = vpack.c.bf16 %v343_v35, %v342_v34  ;;  %v344_v40 = vld [vmem:[%s1616_s28 + $0x70] sm:$0xff]  ;;  %v345_v41 = vld [vmem:[%s1616_s28 + $0x78] sm:$0xff]  ;;  %v999_v42 = vpack.c.bf16 %v432_v38, %v431_v37  ;;  %v433_v43 = vld [vmem:[%s1622_s24 + $0x60] sm:$0xff] }
  0xa7   : > { %v434_v44 = vld [vmem:[%s1622_s24 + $0x68] sm:$0xff]  ;;  %v975_v45 = vpack.c.bf16 %v345_v41, %v344_v40  ;;  %v435_v47 = vld [vmem:[%s1622_s24 + $0x70] sm:$0xff]  ;;  %v436_v48 = vld [vmem:[%s1622_s24 + $0x78] sm:$0xff] }
  0xa8   : > { %986 = vmatpush3.bf16.msra.mxu1 %v983_v18  ;;  %v1003_v46 = vpack.c.bf16 %v434_v44, %v433_v43  ;;  %v1007_v49 = vpack.c.bf16 %v436_v48, %v435_v47  ;;  %v329_v50 = vld [vmem:[#allocation3 + $0x8] sm:$0xff]  ;;  %v530_v51 = vld [vmem:[%s1624_s26] sm:$0xff]  ;;  %v531_v52 = vld [vmem:[%s1624_s26 + $0x8] sm:$0xff] }
  0xa9   : > { %958 = vmatpush3.bf16.msra.mxu0 %v955_v10  ;;  %988 = vmatprep.subr.bf16.mxu1 %v987_v24  ;;  %v1011_v53 = vpack.c.bf16 %v531_v52, %v530_v51  ;;  %v532_v54 = vld [vmem:[%s1624_s26 + $0x10] sm:$0xff]  ;;  %v533_v55 = vld [vmem:[%s1624_s26 + $0x18] sm:$0xff]  ;;  %v534_v57 = vld [vmem:[%s1624_s26 + $0x20] sm:$0xff] }
  0xaa   : > { %960 = vmatprep.subr.bf16.mxu0 %v959_v21  ;;  %v1015_v56 = vpack.c.bf16 %v533_v55, %v532_v54  ;;  %v535_v58 = vld [vmem:[%s1624_s26 + $0x28] sm:$0xff]  ;;  %v536_v60 = vld [vmem:[%s1624_s26 + $0x30] sm:$0xff]  ;;  %v537_v61 = vld [vmem:[%s1624_s26 + $0x38] sm:$0xff] }
  0xab   : > { %v1019_v59 = vpack.c.bf16 %v535_v58, %v534_v57  ;;  %v1023_v62 = vpack.c.bf16 %v537_v61, %v536_v60  ;;  %v538_v63 = vld [vmem:[%s1624_s26 + $0x40] sm:$0xff]  ;;  %v539_v0 = vld [vmem:[%s1624_s26 + $0x48] sm:$0xff]  ;;  %v540_v2 = vld [vmem:[%s1624_s26 + $0x50] sm:$0xff] }
  0xac   : > { %990 = vmatpush3.bf16.msra.mxu1 %v987_v24  ;;  %v1027_v1 = vpack.c.bf16 %v539_v0, %v538_v63  ;;  %v541_v3 = vld [vmem:[%s1624_s26 + $0x58] sm:$0xff]  ;;  %v542_v5 = vld [vmem:[%s1624_s26 + $0x60] sm:$0xff]  ;;  %v543_v6 = vld [vmem:[%s1624_s26 + $0x68] sm:$0xff] }
  0xad   : > { %962 = vmatpush3.bf16.msra.mxu0 %v959_v21  ;;  %992 = vmatprep.subr.bf16.mxu1 %v991_v30  ;;  %v1031_v4 = vpack.c.bf16 %v541_v3, %v540_v2  ;;  %v1035_v7 = vpack.c.bf16 %v543_v6, %v542_v5  ;;  %v544_v8 = vld [vmem:[%s1624_s26 + $0x70] sm:$0xff]  ;;  %v545_v9 = vld [vmem:[%s1624_s26 + $0x78] sm:$0xff]  ;;  %v528_v28 = vld [vmem:[#allocation2] sm:$0xff] }
  0xae   : > { %964 = vmatprep.subr.bf16.mxu0 %v963_v27  ;;  %v1039_v10 = vpack.c.bf16 %v545_v9, %v544_v8 }
  0xb0   : > { %994 = vmatpush3.bf16.msra.mxu1 %v991_v30 }
  0xb1   : > { %966 = vmatpush3.bf16.msra.mxu0 %v963_v27  ;;  %996 = vmatprep.subr.bf16.mxu1 %v995_v36  ;;  %v529_v27 = vld [vmem:[#allocation2 + $0x8] sm:$0xff] }
  0xb2   : > { %968 = vmatprep.subr.bf16.mxu0 %v967_v33 }
  0xb4   : > { %998 = vmatpush3.bf16.msra.mxu1 %v995_v36 }
  0xb5   : > { %970 = vmatpush3.bf16.msra.mxu0 %v967_v33  ;;  %1000 = vmatprep.subr.bf16.mxu1 %v999_v42 }
  0xb6   : > { %972 = vmatprep.subr.bf16.mxu0 %v971_v39 }
  0xb8   : > { %1002 = vmatpush3.bf16.msra.mxu1 %v999_v42 }
  0xb9   : > { %974 = vmatpush3.bf16.msra.mxu0 %v971_v39  ;;  %1004 = vmatprep.subr.bf16.mxu1 %v1003_v46 }
  0xba   : > { %976 = vmatprep.subr.bf16.mxu0 %v975_v45 }
  0xbc   : > { %1006 = vmatpush3.bf16.msra.mxu1 %v1003_v46 }
  0xbd   : > { %978 = vmatpush3.bf16.msra.mxu0 %v975_v45  ;;  %1008 = vmatprep.subr.bf16.mxu1 %v1007_v49 }
  0xbe   : > { %1012 = vmatprep.subr.bf16.mxu0 %v1011_v53 }
  0xc0   : > { %875 = vmatmul.mubr.f32.vlgmr.msra.gmra.mrb[0].mxu0 %v329_v50  ;;  %1010 = vmatpush3.bf16.msra.mxu1 %v1007_v49 }
  0xc1   : > { %1014 = vmatpush3.bf16.msra.mxu0 %v1011_v53 }
  0xc2   : > { %1016 = vmatprep.subr.bf16.mxu0 %v1015_v56 }
  0xc3   : > { %910 = vmatmul.mubr.f32.vlgmr.msra.gmra.mrb[0].mxu1 %v329_v50 }
  0xc5   : > { %1018 = vmatpush3.bf16.msra.mxu0 %v1015_v56 }
  0xc6   : > { %1020 = vmatprep.subr.bf16.mxu0 %v1019_v59 }
  0xc9   : > { %1022 = vmatpush3.bf16.msra.mxu0 %v1019_v59 }
  0xca   : > { %1024 = vmatprep.subr.bf16.mxu0 %v1023_v62 }
  0xcd   : > { %1026 = vmatpush3.bf16.msra.mxu0 %v1023_v62 }
  0xce   : > { %1028 = vmatprep.subr.bf16.mxu0 %v1027_v1 }
  0xd1   : > { %1030 = vmatpush3.bf16.msra.mxu0 %v1027_v1 }
  0xd2   : > { %1032 = vmatprep.subr.bf16.mxu0 %v1031_v4 }
  0xd5   : > { %1034 = vmatpush3.bf16.msra.mxu0 %v1031_v4 }
  0xd6   : > { %1036 = vmatprep.subr.bf16.mxu0 %v1035_v7 }
  0xd9   : > { %1038 = vmatpush3.bf16.msra.mxu0 %v1035_v7 }
  0xda   : > { %1040 = vmatprep.subr.bf16.mxu0 %v1039_v10 }
  0xdd   : > { %1042 = vmatpush3.bf16.msra.mxu0 %v1039_v10 }
 0x193   : > { %v876_v11 = vpop.f32.mrb[0].mxu0 }
 0x194   : > { %v781_v12 = vmul.f32 -1.442695, %v876_v11  ;;  %v412_v13 = vpop.f32.mrb[1].mxu0 }
 0x195   : > { %v780_v14 = vmul.f32 -1.442695, %v412_v13 }
 0x196   : > { %1132 = vpow2.f32 %v781_v12  ;;  %v911_v15 = vpop.f32.mrb[0].mxu1 }
 0x197   : > { %1134 = vpow2.f32 %v780_v14  ;;  %v503_v16 = vpop.f32.mrb[1].mxu1 }
 0x1a0   : > { %v1133_v17 = vpop.eup %1132 }
 0x1a1   : > { %v1135_v18 = vpop.eup %1134  ;;  %v519_v19 = vadd.f32 1.0, %v1133_v17 }
 0x1a2   : > { %v518_v20 = vadd.f32 1.0, %v1135_v18 }
 0x1a3   : > { %1136 = vrcp.f32 %v519_v19 }
 0x1a4   : > { %1138 = vrcp.f32 %v518_v20 }
 0x1ad   : > { %v1137_v21 = vpop.eup %1136 }
 0x1ae   : > { %v1139_v22 = vpop.eup %1138  ;;  %v525_v23 = vmul.f32 %v1137_v21, %v876_v11 }
 0x1af   : > { %v524_v24 = vmul.f32 %v1139_v22, %v412_v13 }
 0x1b0   : > { %v527_v25 = vmul.f32 %v911_v15, %v525_v23 }
 0x1b1   : > { %v526_v26 = vmul.f32 %v524_v24, %v503_v16 }
 0x1b3   : > { %944 = vmatprep.mubr.f32.mxu0 %v526_v26 }
 0x1b4   : > { %945 = vmatmul.mubr.f32.vlgmr.msra.gmra.mrb[2].mxu0 %v527_v25 }
 0x285   : > { %628 = sbr.rel (%p782_p4) target bundleno = 660 (0x294), region = 60 }
 0x287   : > { %v946_v29 = vpop.f32.mrb[2].mxu0 }
 0x288   : > { %v622_v30 = vadd.f32 %v946_v29, %v529_v27  ;;  %v612_v31 = vpop.f32.mrb[3].mxu0 }
 0x289   : > { %v621_v32 = vadd.f32 %v612_v31, %v528_v28 }
 0x28a   : > { %624 = vst [vmem:[#allocation2 + $0x8] sm:$0xff] %v622_v30 }
 0x28b   : > { %623 = vst [vmem:[#allocation2] sm:$0xff] %v621_v32 }
 0x291   : > { %v630_v34 = vld [vmem:[#allocation2 + $0x8] sm:$0xff] }
 0x292   : > { %v629_v33 = vld [vmem:[#allocation2] sm:$0xff]  ;;  %632 = vst [vmem:[#allocation11 + $0x8] sm:$0xff] %v630_v34 }
 0x293   : > { %631 = vst [vmem:[#allocation11] sm:$0xff] %v629_v33 }
 0x294 PF: > { %p1074_p7 = scmp.eq.s32.totalorder %s1491_s30, 1  ;;  %s1356_s5 = smov [#allocation11]  }
 0x295   : > { %s642_s23 = sshll.u32 %s1356_s5, 4  ;;  %s643_s23 = int_to_ptr.vmem [resolvable:$true] %s642_s23 }
 0x296   : > { %s1258_s8 = scalar_lea.vmem %s643_s23, 256  ;;  %p1265_p6 = scmp.lt.s32.totalorder %s643_s23, %s643_s23 }
 0x297   : > { %p1259_p9 = scmp.ne.s32.totalorder %s643_s23, %s1258_s8  ;;  %p1266_p13 = scmp.lt.s32.totalorder %s1258_s8, %s1258_s8 }
 0x299   : > { %p1260_p12 = pnand %p1259_p9, %p1074_p7  ;;  %p1267_p3 = por %p1266_p13, %p1265_p6 }
 0x29b   : > { %p1261_p10 = pneg %p1260_p12 }
 0x29d   : > { %p1268_p2 = pnand %p1267_p3, %p1261_p10 }
 0x29f   : > { %1271 = shalt.err (!%p1268_p2)
}
 0x2a0   : > { %s1272_s29 = scalar_lea.hbm %s1725_s4, 256 }
 0x2a1   : > { %p1273_p8 = scmp.ne.s32.totalorder %s1725_s4, %s1272_s29  ;;  %p1278_p0 = scmp.lt.u32.totalorder %s1272_s29, %s1725_s4 }
 0x2a3   : > { %p1274_p5 = pnand %p1273_p8, %p1074_p7 }
 0x2a5   : > { %p1275_p11 = pneg %p1274_p5 }
 0x2a7   : > { %p1280_p1 = pnand %p1278_p0, %p1275_p11 }
 0x2a9   : > { %1283 = shalt.err (!%p1280_p1)
}
 0x2aa   : > { %s1357_s25 = smov 128   ;;  %s1358_s10 = smov 8  }
 0x2ab   : > { %1054 = dma.vmem_to_hbm [thread:$0]  (%p1074_p7), %s643_s23, 256, %s1725_s4, [#allocation5], %s1357_s25, %s1357_s25, %s1358_s10  }
 0x2ac   : > { %1321 = dma.done.wait (%p1074_p7), [#allocation5], 256  }
 0x2ad   : > { %1323 = vsyncadd (%p1074_p7), [#allocation5], 4294967040 }
 0x2ae PF: > { %s22_s20 = sadd.s32 1, %s1346_s20   ;;  %s1757_s15 = smov %s1330_s16 }
 0x2af   : > { %p19_p4 = scmp.ge.s32.totalorder %s22_s20, 4   ;;  %s1758_s16 = smov %s1334_s17 }
 0x2b0   : > { %s1759_s17 = smov %s1431_s27  ;;  %s1760_s18 = smov %s1342_s19 }
 0x2b1   : > { %s1761_s19 = smov %s1763_s21  ;;  %21 = sbr.rel (!%p19_p4) target bundleno = 11 (0xb), region = 112 }
 0x2b8   :  { %658 = vsyncpa [#allocation4], 1 }
 0x2b9   :  { %660 = vsyncpa [#allocation4 + $0x1], 1 }
 0x2ba   :  { %661 = vsyncpa [#allocation7], 1 }
 0x2bb   :  { %663 = vsyncpa [#allocation7 + $0x1], 1 }
 0x2bc   :  { %664 = vsyncpa [#allocation10], 1 }
 0x2bd   :  { %666 = vsyncpa [#allocation10 + $0x1], 1 }
 0x2be   :  { %667 = vsyncpa [#allocation5], 1 }
 0x2bf   :  { %669 = vsyncpa [#allocation5 + $0x1], 1 }

</bundles_post_ra>
